<compile_context>
chip_gen: v7x
topology: tpu7x:2x2x1
jax: 0.10.0
libtpu: 0.0.40
codegen_flags: <defaults>
</compile_context>

<pallas_src>
import functools
import math

import jax
import jax.numpy as jnp
from jax.experimental import pallas as pl
from jax.experimental.pallas import tpu as pltpu

_LANE = 128                        # batch tile granularity (lane width)
_VMEM_BUDGET = 24 * 1024 * 1024    # working-set budget (fits v7x 32 MiB scoped VMEM)
_VMEM_LIMIT = 32 * 1024 * 1024     # raise v5e's 16 MiB scoped default; default elsewhere


def _round_up(x, m):
    return ((x + m - 1) // m) * m


def _disc_wordlen_kernel(use_sigmoid, n,
                         emo_ref,   # VMEM [3, TB] f32  (emotion, transposed)
                         rwl_ref,   # VMEM [N, TB] f32  (relative_word_length, transposed)
                         p_ref,     # SMEM [16]    f32  (packed W1|b1|W2|b2|pad)
                         out_ref):  # VMEM [1, TB] f32  (lane-dense output slab)
    emo = emo_ref[...]                       # [3, TB]
    rwl = rwl_ref[...]                       # [N, TB]

    # ---- fc_1: Linear(3, 2) + LeakyReLU(0.2) ----
    # Scalar weights from SMEM broadcast over the lane (batch) axis: pure VPU work.
    # Packing: p[0:6]=W1 (row-major [2,3]), p[6:8]=b1, p[8:14]=W2, p[14]=b2.
    e0, e1, e2 = emo[0:1, :], emo[1:2, :], emo[2:3, :]             # [1, TB] each
    z0 = e0 * p_ref[0] + e1 * p_ref[1] + e2 * p_ref[2] + p_ref[6]
    z1 = e0 * p_ref[3] + e1 * p_ref[4] + e2 * p_ref[5] + p_ref[7]
    a0 = jnp.maximum(z0, 0.2 * z0)           # LeakyReLU(0.2), single VALU op
    a1 = jnp.maximum(z1, 0.2 * z1)

    # ---- statistics over relative_word_length (per sample = per lane) ----
    s = jnp.sum(rwl, axis=0, keepdims=True)                        # [1, TB]
    mean = s * (1.0 / float(n))
    mx = jnp.max(rwl, axis=0, keepdims=True)
    mn = jnp.min(rwl, axis=0, keepdims=True)
    # Two-pass unbiased std (torch.std default, divide by n-1); rwl is VMEM-resident,
    # so the second pass is free at mem-bound and numerically robust.
    centered = rwl - mean
    ss = jnp.sum(centered * centered, axis=0, keepdims=True)
    inv_nm1 = (1.0 / float(n - 1)) if n > 1 else float("nan")      # n==1 -> NaN like torch
    std = jnp.sqrt(ss * inv_nm1)

    # ---- fc_2: Linear(6, 1) on cat([a0, a1, std, max, min, mean]) ----
    h = (a0 * p_ref[8] + a1 * p_ref[9]
         + std * p_ref[10] + mx * p_ref[11] + mn * p_ref[12] + mean * p_ref[13]
         + p_ref[14])                                              # [1, TB]
    if use_sigmoid:
        h = jax.nn.sigmoid(h)
    out_ref[...] = h.astype(out_ref.dtype)


def disc_wordlen_forward(emotion, relative_word_length, params, criterion="WGAN"):
    """emotion: [B, 3] f32; relative_word_length: [B, N] f32; returns [B, 1] f32.

    Each batch row is one independent invocation of the original (batch=1) forward.
    """
    B, N = relative_word_length.shape
    assert emotion.shape == (B, 3)
    assert N >= 1
    use_sigmoid = (criterion == "BCE")

    # --- choose the batch tile (lanes per grid step) ---
    # Double-buffered columns: rwl (2*N) + emotion (2*3) + out (2*1) f32 words per sample.
    per_col_bytes = 4 * (2 * N + 2 * 3 + 2 * 1)
    tb_cap = max(_LANE, (_VMEM_BUDGET // per_col_bytes) // _LANE * _LANE)
    b_pad_min = _round_up(B, _LANE)
    tb = min(tb_cap, b_pad_min)
    if b_pad_min >= 2 * _LANE and tb >= b_pad_min:
        # Whole batch fits in one tile: split into >=2 blocks so "parallel" grid axis
        # can shard across v7x's two TensorCores (no-op cost on v5e/v6e).
        tb = _round_up(pl.cdiv(b_pad_min, 2), _LANE)
    b_pad = _round_up(B, tb)
    grid = (b_pad // tb,)

    # --- batch-on-lanes layout: transpose + pad batch to b_pad (padding sliced off) ---
    emo_t = jnp.pad(emotion.astype(jnp.float32).T, ((0, 0), (0, b_pad - B)))       # [3, b_pad]
    rwl_t = jnp.pad(relative_word_length.astype(jnp.float32).T,
                    ((0, 0), (0, b_pad - B)))                                       # [N, b_pad]

    # Pack all weights into one flat SMEM blob (single operand, one descriptor).
    packed = jnp.concatenate([
        params["w1"].reshape(-1).astype(jnp.float32),   # 6
        params["b1"].reshape(-1).astype(jnp.float32),   # 2
        params["w2"].reshape(-1).astype(jnp.float32),   # 6
        params["b2"].reshape(-1).astype(jnp.float32),   # 1
        jnp.zeros((1,), jnp.float32),                    # pad -> 16 words
    ])

    cost = pl.CostEstimate(
        flops=int(B * (3 * N + 40)),
        transcendentals=int(B * (2 if use_sigmoid else 1)),
        bytes_accessed=int(4 * (B * N + 3 * B + B) + 64),
    )

    kernel = functools.partial(_disc_wordlen_kernel, use_sigmoid, N)
    out = pl.pallas_call(
        kernel,
        out_shape=jax.ShapeDtypeStruct((1, b_pad), jnp.float32),
        grid=grid,
        in_specs=[
            pl.BlockSpec((3, tb), lambda b: (0, b)),                      # emotion (transposed)
            pl.BlockSpec((N, tb), lambda b: (0, b)),                      # rwl (transposed)
            pl.BlockSpec(memory_space=pltpu.MemorySpace.SMEM),            # packed params
        ],
        out_specs=pl.BlockSpec((1, tb), lambda b: (0, b)),                # lane-dense output
        compiler_params=pltpu.CompilerParams(
            dimension_semantics=("parallel",),        # v7x: shard batch tiles across 2 TCs
            vmem_limit_bytes=_VMEM_LIMIT),
        cost_estimate=cost,
    )(emo_t, rwl_t, packed)
    return out[0, :B][:, None]                                            # [B, 1]


def disc_wordlen_reference(emotion, relative_word_length, params, criterion="WGAN"):
    """Pure-JAX reference matching the PyTorch forward, vectorized over batch rows."""
    z = emotion @ params["w1"].T + params["b1"]
    e = jnp.where(z > 0, z, 0.2 * z)
    rwl = relative_word_length
    std = jnp.std(rwl, axis=1, ddof=1, keepdims=True)
    mx = jnp.max(rwl, axis=1, keepdims=True)
    mn = jnp.min(rwl, axis=1, keepdims=True)
    mean = jnp.mean(rwl, axis=1, keepdims=True)
    h_ = jnp.concatenate([e, std, mx, mn, mean], axis=1)   # [B, 6]
    h = h_ @ params["w2"].T + params["b2"]                  # [B, 1]
    if criterion == "BCE":
        h = jax.nn.sigmoid(h)
    return h


if __name__ == "__main__":
    key = jax.random.PRNGKey(0)
    k_emo, k_rwl, k_w1, k_b1, k_w2, k_b2 = jax.random.split(key, 6)

    # Deterministic parameter init (PyTorch-style uniform(-1/sqrt(fan_in), 1/sqrt(fan_in))).
    lim1 = 1.0 / math.sqrt(3.0)
    lim2 = 1.0 / math.sqrt(6.0)
    params = {
        "w1": jax.random.uniform(k_w1, (2, 3), jnp.float32, -lim1, lim1),
        "b1": jax.random.uniform(k_b1, (2,), jnp.float32, -lim1, lim1),
        "w2": jax.random.uniform(k_w2, (1, 6), jnp.float32, -lim2, lim2),
        "b2": jax.random.uniform(k_b2, (1,), jnp.float32, -lim2, lim2),
    }

    # TODO(synk): RMSprop optimizer, StepLR scheduler and compute_gp (autograd gradient
    # penalty) are training-time machinery, not part of the forward pass kernel.

    # Case 1: small batch (exercises lane padding, single grid step).
    # Case 2: B=260 (exercises multi-block grid + megacore split path).
    for (B, N) in ((10, 8), (260, 16)):
        ke, kr = jax.random.split(jax.random.fold_in(k_emo, B), 2)
        emotion = jax.random.normal(ke, (B, 3), dtype=jnp.float32)
        relative_word_length = jax.random.uniform(kr, (B, N), dtype=jnp.float32)
        for crit in ("WGAN", "BCE"):
            out = disc_wordlen_forward(emotion, relative_word_length, params, criterion=crit)
            out = jax.block_until_ready(out)
            ref = disc_wordlen_reference(emotion, relative_word_length, params, criterion=crit)
            assert out.shape == (B, 1), out.shape
            assert jnp.allclose(out, ref, atol=1e-5, rtol=1e-5), (crit, B, N, out, ref)

    print("KERNEL_OK")
</pallas_src>

<mosaic_0001>
module attributes {stable_mosaic.version = 11 : i64} {
  func.func @_disc_wordlen_kernel(%arg0: i32, %arg1: memref<3x128xf32, #tpu.memory_space<vmem>>, %arg2: memref<8x128xf32, #tpu.memory_space<vmem>>, %arg3: memref<16xf32, #tpu.memory_space<smem>>, %arg4: memref<1x128xf32, #tpu.memory_space<vmem>>) attributes {dimension_semantics = [#tpu.dimension_semantics<parallel>], iteration_bounds = array<i64: 1>, scalar_prefetch = 0 : i64, scratch_operands = 0 : i64, tpu.core_type = #tpu.core_type<tc>, window_params = [{transform_indices = @transform_0, window_bounds = array<i64: 3, 128>}, {transform_indices = @transform_1, window_bounds = array<i64: 8, 128>}, {transform_indices = @transform_2, window_bounds = array<i64: 16>}, {transform_indices = @transform_3, window_bounds = array<i64: 1, 128>}]} {
    %c0 = arith.constant 0 : index
    %c0_0 = arith.constant 0 : index
    %0 = vector.load %arg1[%c0, %c0_0] : memref<3x128xf32, #tpu.memory_space<vmem>>, vector<3x128xf32>
    %c0_1 = arith.constant 0 : index
    %c0_2 = arith.constant 0 : index
    %1 = vector.load %arg2[%c0_1, %c0_2] : memref<8x128xf32, #tpu.memory_space<vmem>>, vector<8x128xf32>
    %2 = vector.extract_strided_slice %0 {offsets = [0, 0], sizes = [1, 128], strides = [1, 1]} : vector<3x128xf32> to vector<1x128xf32>
    %3 = vector.extract_strided_slice %0 {offsets = [1, 0], sizes = [1, 128], strides = [1, 1]} : vector<3x128xf32> to vector<1x128xf32>
    %4 = vector.extract_strided_slice %0 {offsets = [2, 0], sizes = [1, 128], strides = [1, 1]} : vector<3x128xf32> to vector<1x128xf32>
    %c0_3 = arith.constant 0 : index
    %5 = memref.load %arg3[%c0_3] : memref<16xf32, #tpu.memory_space<smem>>
    %6 = vector.broadcast %5 : f32 to vector<1x128xf32>
    %7 = arith.mulf %2, %6 : vector<1x128xf32>
    %c1 = arith.constant 1 : index
    %8 = memref.load %arg3[%c1] : memref<16xf32, #tpu.memory_space<smem>>
    %9 = vector.broadcast %8 : f32 to vector<1x128xf32>
    %10 = arith.mulf %3, %9 : vector<1x128xf32>
    %11 = arith.addf %7, %10 : vector<1x128xf32>
    %c2 = arith.constant 2 : index
    %12 = memref.load %arg3[%c2] : memref<16xf32, #tpu.memory_space<smem>>
    %13 = vector.broadcast %12 : f32 to vector<1x128xf32>
    %14 = arith.mulf %4, %13 : vector<1x128xf32>
    %15 = arith.addf %11, %14 : vector<1x128xf32>
    %c6 = arith.constant 6 : index
    %16 = memref.load %arg3[%c6] : memref<16xf32, #tpu.memory_space<smem>>
    %17 = vector.broadcast %16 : f32 to vector<1x128xf32>
    %18 = arith.addf %15, %17 : vector<1x128xf32>
    %c3 = arith.constant 3 : index
    %19 = memref.load %arg3[%c3] : memref<16xf32, #tpu.memory_space<smem>>
    %20 = vector.broadcast %19 : f32 to vector<1x128xf32>
    %21 = arith.mulf %2, %20 : vector<1x128xf32>
    %c4 = arith.constant 4 : index
    %22 = memref.load %arg3[%c4] : memref<16xf32, #tpu.memory_space<smem>>
    %23 = vector.broadcast %22 : f32 to vector<1x128xf32>
    %24 = arith.mulf %3, %23 : vector<1x128xf32>
    %25 = arith.addf %21, %24 : vector<1x128xf32>
    %c5 = arith.constant 5 : index
    %26 = memref.load %arg3[%c5] : memref<16xf32, #tpu.memory_space<smem>>
    %27 = vector.broadcast %26 : f32 to vector<1x128xf32>
    %28 = arith.mulf %4, %27 : vector<1x128xf32>
    %29 = arith.addf %25, %28 : vector<1x128xf32>
    %c7 = arith.constant 7 : index
    %30 = memref.load %arg3[%c7] : memref<16xf32, #tpu.memory_space<smem>>
    %31 = vector.broadcast %30 : f32 to vector<1x128xf32>
    %32 = arith.addf %29, %31 : vector<1x128xf32>
    %cst = arith.constant 2.000000e-01 : f32
    %33 = vector.broadcast %cst : f32 to vector<1x128xf32>
    %34 = arith.mulf %33, %18 : vector<1x128xf32>
    %35 = arith.maximumf %18, %34 : vector<1x128xf32>
    %cst_4 = arith.constant 2.000000e-01 : f32
    %36 = vector.broadcast %cst_4 : f32 to vector<1x128xf32>
    %37 = arith.mulf %36, %32 : vector<1x128xf32>
    %38 = arith.maximumf %32, %37 : vector<1x128xf32>
    %cst_5 = arith.constant dense<0.000000e+00> : vector<128xf32>
    %39 = vector.multi_reduction <add>, %1, %cst_5 [0] : vector<8x128xf32> to vector<128xf32>
    %40 = vector.shape_cast %39 : vector<128xf32> to vector<1x128xf32>
    %cst_6 = arith.constant 1.250000e-01 : f32
    %41 = vector.broadcast %cst_6 : f32 to vector<1x128xf32>
    %42 = arith.mulf %40, %41 : vector<1x128xf32>
    %cst_7 = arith.constant dense<0xFF800000> : vector<128xf32>
    %43 = vector.multi_reduction <maximumf>, %1, %cst_7 [0] : vector<8x128xf32> to vector<128xf32>
    %44 = vector.shape_cast %43 : vector<128xf32> to vector<1x128xf32>
    %cst_8 = arith.constant dense<0x7F800000> : vector<128xf32>
    %45 = vector.multi_reduction <minimumf>, %1, %cst_8 [0] : vector<8x128xf32> to vector<128xf32>
    %46 = vector.shape_cast %45 : vector<128xf32> to vector<1x128xf32>
    %47 = vector.broadcast %42 : vector<1x128xf32> to vector<8x128xf32>
    %48 = arith.subf %1, %47 : vector<8x128xf32>
    %49 = arith.mulf %48, %48 : vector<8x128xf32>
    %cst_9 = arith.constant dense<0.000000e+00> : vector<128xf32>
    %50 = vector.multi_reduction <add>, %49, %cst_9 [0] : vector<8x128xf32> to vector<128xf32>
    %51 = vector.shape_cast %50 : vector<128xf32> to vector<1x128xf32>
    %cst_10 = arith.constant 0.142857149 : f32
    %52 = vector.broadcast %cst_10 : f32 to vector<1x128xf32>
    %53 = arith.mulf %51, %52 : vector<1x128xf32>
    %54 = math.sqrt %53 : vector<1x128xf32>
    %c8 = arith.constant 8 : index
    %55 = memref.load %arg3[%c8] : memref<16xf32, #tpu.memory_space<smem>>
    %56 = vector.broadcast %55 : f32 to vector<1x128xf32>
    %57 = arith.mulf %35, %56 : vector<1x128xf32>
    %c9 = arith.constant 9 : index
    %58 = memref.load %arg3[%c9] : memref<16xf32, #tpu.memory_space<smem>>
    %59 = vector.broadcast %58 : f32 to vector<1x128xf32>
    %60 = arith.mulf %38, %59 : vector<1x128xf32>
    %61 = arith.addf %57, %60 : vector<1x128xf32>
    %c10 = arith.constant 10 : index
    %62 = memref.load %arg3[%c10] : memref<16xf32, #tpu.memory_space<smem>>
    %63 = vector.broadcast %62 : f32 to vector<1x128xf32>
    %64 = arith.mulf %54, %63 : vector<1x128xf32>
    %65 = arith.addf %61, %64 : vector<1x128xf32>
    %c11 = arith.constant 11 : index
    %66 = memref.load %arg3[%c11] : memref<16xf32, #tpu.memory_space<smem>>
    %67 = vector.broadcast %66 : f32 to vector<1x128xf32>
    %68 = arith.mulf %44, %67 : vector<1x128xf32>
    %69 = arith.addf %65, %68 : vector<1x128xf32>
    %c12 = arith.constant 12 : index
    %70 = memref.load %arg3[%c12] : memref<16xf32, #tpu.memory_space<smem>>
    %71 = vector.broadcast %70 : f32 to vector<1x128xf32>
    %72 = arith.mulf %46, %71 : vector<1x128xf32>
    %73 = arith.addf %69, %72 : vector<1x128xf32>
    %c13 = arith.constant 13 : index
    %74 = memref.load %arg3[%c13] : memref<16xf32, #tpu.memory_space<smem>>
    %75 = vector.broadcast %74 : f32 to vector<1x128xf32>
    %76 = arith.mulf %42, %75 : vector<1x128xf32>
    %77 = arith.addf %73, %76 : vector<1x128xf32>
    %c14 = arith.constant 14 : index
    %78 = memref.load %arg3[%c14] : memref<16xf32, #tpu.memory_space<smem>>
    %79 = vector.broadcast %78 : f32 to vector<1x128xf32>
    %80 = arith.addf %77, %79 : vector<1x128xf32>
    %c0_11 = arith.constant 0 : index
    %c0_12 = arith.constant 0 : index
    %81 = vector.load %arg4[%c0_11, %c0_12] : memref<1x128xf32, #tpu.memory_space<vmem>>, vector<1x128xf32>
    tpu.vector_store %arg4[%c0_11, %c0_12], %80 {strides = array<i32>} : memref<1x128xf32, #tpu.memory_space<vmem>>, vector<1x128xf32>,
    return
  }
  func.func @transform_0(%arg0: i32) -> (i32, i32) {
    %c0_i32 = arith.constant 0 : i32
    %c0_i32_0 = arith.constant 0 : i32
    return %c0_i32, %arg0 : i32, i32
  }
  func.func @transform_1(%arg0: i32) -> (i32, i32) {
    %c0_i32 = arith.constant 0 : i32
    %c0_i32_0 = arith.constant 0 : i32
    return %c0_i32, %arg0 : i32, i32
  }
  func.func @transform_2(%arg0: i32) -> i32 {
    %c0_i32 = arith.constant 0 : i32
    %c0_i32_0 = arith.constant 0 : i32
    return %c0_i32 : i32
  }
  func.func @transform_3(%arg0: i32) -> (i32, i32) {
    %c0_i32 = arith.constant 0 : i32
    %c0_i32_0 = arith.constant 0 : i32
    return %c0_i32, %arg0 : i32, i32
  }
}

</mosaic_0001>

<bundles_post_ra>
// kernel: tpu_custom_call.1
= control target key start
LH: loop header
LB: loop body
LE: loop exit
PB: predicated region body
PF: predicated region fallthrough
CT: control target
= control target key end

     0   :  { %8 = vsyncpa [#allocation3], 0  ;;  %s350_s0 = inlined_call_operand.hbm [shape: f32[3,128], index: 0, kind: input, shape index: {}]   ;;  %s351_s1 = inlined_call_operand.hbm [shape: f32[8,128], index: 1, kind: input, shape index: {}]   ;;  %s352_s2 = inlined_call_operand.vmem [shape: f32[16], index: 2, kind: input, shape index: {}]   ;;  %s353_s3 = inlined_call_operand.hbm [shape: f32[1,128], index: 3, kind: output, shape index: {}]  }
   0x1   :  { %9 = vsyncpa [#allocation7], 0 }
   0x2   :  { %10 = vsyncpa [#allocation5], 0 }
   0x3   :  { %11 = vsyncpa [#allocation4], 0  ;;  %s283_s12 = smov [#allocation2]   ;;  %s284_s14 = smov [#allocation6]  }
   0x4   :  { %s18_s13 = sshll.u32 %s283_s12, 4  ;;  %s28_s15 = sshll.u32 %s284_s14, 4  ;;  %s19_s13 = int_to_ptr.vmem [resolvable:$true] %s18_s13  ;;  %s29_s15 = int_to_ptr.vmem [resolvable:$true] %s28_s15 }
   0x5   :  { %s197_s18 = scalar_lea.hbm %s350_s0, 64 }
   0x6   :  { %p198_p0 = scmp.ne.s32.totalorder %s350_s0, %s197_s18  ;;  %p201_p1 = scmp.lt.u32.totalorder %s197_s18, %s350_s0 }
   0x8   :  { %p203_p2 = pnand %p201_p1, %p198_p0 }
   0xa   :  { %206 = shalt.err (!%p203_p2)
}
   0xb   :  { %s207_s23 = scalar_lea.vmem %s19_s13, 64  ;;  %p212_p4 = scmp.lt.s32.totalorder %s19_s13, %s19_s13 }
   0xc   :  { %p208_p3 = scmp.ne.s32.totalorder %s19_s13, %s207_s23  ;;  %p213_p5 = scmp.lt.s32.totalorder %s207_s23, %s207_s23 }
   0xe   :  { %p214_p6 = por %p213_p5, %p212_p4 }
  0x10   :  { %p215_p7 = pnand %p214_p6, %p208_p3 }
  0x12   :  { %218 = shalt.err (!%p215_p7)
}
  0x13   :  { %21 = dma.hbm_to_vmem [thread:$0]  %s350_s0, 64, %s19_s13, [#allocation3]  }
  0x14   :  { %s219_s28 = scalar_lea.hbm %s351_s1, 128 }
  0x15   :  { %p220_p8 = scmp.ne.s32.totalorder %s351_s1, %s219_s28  ;;  %p223_p9 = scmp.lt.u32.totalorder %s219_s28, %s351_s1 }
  0x17   :  { %p225_p10 = pnand %p223_p9, %p220_p8 }
  0x19   :  { %228 = shalt.err (!%p225_p10)
}
  0x1a   :  { %s229_s6 = scalar_lea.vmem %s29_s15, 128  ;;  %p234_p12 = scmp.lt.s32.totalorder %s29_s15, %s29_s15 }
  0x1b   :  { %p230_p11 = scmp.ne.s32.totalorder %s29_s15, %s229_s6  ;;  %p235_p13 = scmp.lt.s32.totalorder %s229_s6, %s229_s6 }
  0x1d   :  { %p236_p0 = por %p235_p13, %p234_p12 }
  0x1f   :  { %p237_p1 = pnand %p236_p0, %p230_p11 }
  0x21   :  { %240 = shalt.err (!%p237_p1)
}
  0x22   :  { %31 = dma.hbm_to_vmem [thread:$0]  %s351_s1, 128, %s29_s15, [#allocation7]  }
  0x23   :  { %s38_s10 = sshll.u32 %s352_s2, 4  ;;  %s39_s10 = int_to_ptr.vmem [resolvable:$true] %s38_s10 }
  0x24   :  { %s241_s11 = scalar_lea.vmem %s39_s10, 16  ;;  %p246_p3 = scmp.lt.s32.totalorder %s39_s10, %s39_s10 }
  0x25   :  { %p242_p2 = scmp.ne.s32.totalorder %s39_s10, %s241_s11  ;;  %p247_p4 = scmp.lt.s32.totalorder %s241_s11, %s241_s11 }
  0x27   :  { %p248_p5 = por %p247_p4, %p246_p3 }
  0x29   :  { %p249_p6 = pnand %p248_p5, %p242_p2 }
  0x2b   :  { %252 = shalt.err (!%p249_p6)
}
  0x2c   :  { %s285_s12 = smov [#allocation8]  }
  0x2d   :  { %41 = dma.vmem_to_smem %s39_s10, 16, %s285_s12, [#allocation5]  }
  0x2e   :  { %275 = dma.done.wait [#allocation3], 64  }
  0x2f   :  { %276 = vsyncadd [#allocation3], 4294967232 }
  0x30   :  { %277 = dma.done.wait [#allocation7], 128  }
  0x31   :  { %278 = vsyncadd [#allocation7], 4294967168 }
  0x32   :  { %279 = dma.done.wait [#allocation5], 16  }
  0x33   :  { %280 = vsyncadd [#allocation5], 4294967280 }
  0x34   :  { %51 = sfence }
  0x35   :  { %v53_v0 = vld [vmem:[#allocation6] sm:$0xff]  ;;  %s177_s1 = sld [smem:[#allocation8 + $0x1]]  ;;  %s181_s2 = sld [smem:[#allocation8 + $0x4]]  ;;  %v52_v6 = vld [vmem:[#allocation2] sm:$0x7] }
  0x36   :  { %v98_v1 = vrot.slane %v53_v0, 4  ;;  %s54_s13 = sld [smem:[#allocation8]]  ;;  %s178_s14 = sld [smem:[#allocation8 + $0x2]] }
  0x37   :  { %s180_s15 = sld [smem:[#allocation8 + $0x3]]  ;;  %s182_s16 = sld [smem:[#allocation8 + $0x5]] }
  0x38   :  { %v99_v2 = vadd.f32 %v98_v1, %v53_v0  ;;  %s179_s17 = sld [smem:[#allocation8 + $0x6]]  ;;  %s183_s18 = sld [smem:[#allocation8 + $0x7]]  ;;  %v106_v38 = vmax.f32 %v53_v0, %v98_v1  ;;  %v112_v42 = vmin.f32 %v53_v0, %v98_v1 }
  0x39   :  { %s184_s19 = sld [smem:[#allocation8 + $0x8]]  ;;  %s185_s20 = sld [smem:[#allocation8 + $0x9]] }
  0x3a   :  { %v100_v3 = vrot.slane %v99_v2, 2  ;;  %v107_v44 = vrot.slane %v106_v38, 2  ;;  %v113_v47 = vrot.slane %v112_v42, 2  ;;  %s186_s21 = sld [smem:[#allocation8 + $0xa]]  ;;  %s187_s22 = sld [smem:[#allocation8 + $0xb]] }
  0x3b   :  { %v58_v7 = vstv %s177_s1  ;;  %v78_v8 = vstv %s181_s2  ;;  %s188_s23 = sld [smem:[#allocation8 + $0xc]]  ;;  %s189_s24 = sld [smem:[#allocation8 + $0xd]] }
  0x3c   :  { %v101_v4 = vadd.f32 %v100_v3, %v99_v2  ;;  %v55_v11 = vstv %s54_s13  ;;  %v59_v12 = vmul.f32 %v58_v7, %v52_v6  ;;  %v65_v13 = vstv %s178_s14  ;;  %s190_s25 = sld [smem:[#allocation8 + $0xe]]  ;;  %s286_s26 = smov [#allocation9]  }
  0x3d   :  { %v79_v14 = vmul.f32 %v78_v8, %v52_v6  ;;  %v75_v15 = vstv %s180_s15  ;;  %v85_v16 = vstv %s182_s16  ;;  %v56_v18 = vmul.f32 %v55_v11, %v52_v6  ;;  %s166_s27 = sshll.u32 %s286_s26, 4  ;;  %s167_s27 = int_to_ptr.vmem [resolvable:$true] %s166_s27 }
  0x3e   :  { %v102_v5 = vrot.slane %v101_v4, 1  ;;  %v66_v19 = vmul.f32 %v65_v13, %v52_v6  ;;  %v61_v21 = vrot.slane %v59_v12, 1  ;;  %v76_v22 = vmul.f32 %v75_v15, %v52_v6  ;;  %s253_s28 = scalar_lea.vmem %s167_s27, 16  ;;  %s257_s29 = scalar_lea.vmem %s167_s27, 32 }
  0x3f   :  { %v81_v23 = vrot.slane %v79_v14, 1  ;;  %v86_v24 = vmul.f32 %v85_v16, %v52_v6  ;;  %v72_v35 = vstv %s179_s17  ;;  %v92_v36 = vstv %s183_s18  ;;  %p254_p7 = scmp.ne.s32.totalorder %s167_s27, %s253_s28  ;;  %p258_p8 = scmp.lt.s32.totalorder %s167_s27, %s167_s27 }
  0x40   :  { %v103_v9 = vadd.f32 %v102_v5, %v101_v4  ;;  %v63_v27 = vadd.f32 %v61_v21, %v56_v18  ;;  %v68_v28 = vrot.slane %v66_v19, 2  ;;  %v108_v48 = vmax.f32 %v106_v38, %v107_v44  ;;  %p259_p9 = scmp.lt.s32.totalorder %s257_s29, %s253_s28 }
  0x41   :  { %v83_v29 = vadd.f32 %v81_v23, %v76_v22  ;;  %v88_v30 = vrot.slane %v86_v24, 2  ;;  %v114_v51 = vmin.f32 %v112_v42, %v113_v47  ;;  %v134_v52 = vstv %s184_s19 }
  0x42   :  { %v334_v10 = vmul.f32 0.125, %v103_v9  ;;  %v70_v33 = vadd.f32 %v68_v28, %v63_v27  ;;  %v137_v53 = vstv %s185_s20  ;;  %v109_v54 = vrot.slane %v108_v48, 1  ;;  %p260_p10 = por %p259_p9, %p258_p8 }
  0x43   :  { %v90_v34 = vadd.f32 %v88_v30, %v83_v29  ;;  %v115_v55 = vrot.slane %v114_v51, 1  ;;  %v141_v62 = vstv %s186_s21  ;;  %v145_v63 = vstv %s187_s22 }
  0x44   :  { %v117_v17 = vsub.f32 %v53_v0, %v334_v10  ;;  %v73_v40 = vadd.f32 %v72_v35, %v70_v33  ;;  %v110_v60 = vmax.f32 %v108_v48, %v109_v54  ;;  %v149_v4 = vstv %s188_s23  ;;  %p261_p11 = pnand %p260_p10, %p254_p7 }
  0x45   :  { %v93_v41 = vadd.f32 %v92_v36, %v90_v34  ;;  %v116_v0 = vmin.f32 %v114_v51, %v115_v55  ;;  %v153_v7 = vstv %s189_s24  ;;  %v157_v14 = vstv %s190_s25 }
  0x46   :  { %v118_v20 = vmul.f32 %v117_v17, %v117_v17  ;;  %v94_v45 = vmul.f32 0.2, %v73_v40  ;;  %v146_v6 = vmul.f32 %v145_v63, %v110_v60  ;;  %v154_v12 = vmul.f32 %v153_v7, %v334_v10 }
  0x47   :  { %v96_v46 = vmul.f32 0.2, %v93_v41  ;;  %v150_v9 = vmul.f32 %v149_v4, %v116_v0 }
  0x48   :  { %v119_v25 = vrot.slane %v118_v20, 4  ;;  %v95_v49 = vmax.f32 %v73_v40, %v94_v45 }
  0x49   :  { %v97_v50 = vmax.f32 %v93_v41, %v96_v46 }
  0x4a   :  { %v120_v26 = vadd.f32 %v119_v25, %v118_v20  ;;  %v135_v56 = vmul.f32 %v134_v52, %v95_v49 }
  0x4b   :  { %v138_v57 = vmul.f32 %v137_v53, %v97_v50 }
  0x4c   :  { %v121_v31 = vrot.slane %v120_v26, 2 }
  0x4d   :  { %v139_v2 = vadd.f32 %v138_v57, %v135_v56 }
  0x4e   :  { %v122_v32 = vadd.f32 %v121_v31, %v120_v26 }
  0x50   :  { %v123_v37 = vrot.slane %v122_v32, 1 }
  0x52   :  { %v124_v39 = vadd.f32 %v123_v37, %v122_v32 }
  0x54   :  { %v125_v43 = vmul.f32 0.14285715, %v124_v39 }
  0x56   :  { %195 = vrsqrt.f32 %v125_v43  ;;  %vm128_vm0 = vcmp.eq.f32.partialorder %v125_v43, inf  ;;  %v131_v59 = vand.u32 2147483648, %v125_v43  ;;  %vm130_vm1 = vcmp.eq.f32.partialorder %v125_v43, 0.0 }
  0x60   :  { %v196_v58 = vpop.eup %195 }
  0x61   :  { %v127_v61 = vmul.f32 %v196_v58, %v125_v43 }
  0x63   :  { %v129_v1 = vsel %vm128_vm0, %v125_v43, %v127_v61 }
  0x64   :  { %v132_v3 = vsel %vm130_vm1, %v131_v59, %v129_v1 }
  0x65   :  { %v142_v5 = vmul.f32 %v141_v62, %v132_v3 }
  0x67   :  { %v143_v8 = vadd.f32 %v142_v5, %v139_v2 }
  0x69   :  { %v147_v11 = vadd.f32 %v146_v6, %v143_v8 }
  0x6b   :  { %v151_v13 = vadd.f32 %v150_v9, %v147_v11 }
  0x6d   :  { %v155_v15 = vadd.f32 %v154_v12, %v151_v13 }
  0x6f   :  { %v158_v16 = vadd.f32 %v157_v14, %v155_v15 }
  0x71   :  { %159 = vst [vmem:[#allocation9] sm:$0x1] %v158_v16 }
  0x72   :  { %264 = shalt.err (!%p261_p11)
}
  0x73   :  { %s265_s5 = scalar_lea.hbm %s353_s3, 16 }
  0x74   :  { %p266_p12 = scmp.ne.s32.totalorder %s353_s3, %s265_s5  ;;  %p269_p13 = scmp.lt.u32.totalorder %s265_s5, %s353_s3 }
  0x76   :  { %p271_p0 = pnand %p269_p13, %p266_p12 }
  0x78   :  { %274 = shalt.err (!%p271_p0)
}
  0x79   :  { %169 = dma.vmem_to_hbm [thread:$0]  %s167_s27, 16, %s353_s3, [#allocation4]  }
  0x7a   :  { %281 = dma.done.wait [#allocation4], 16  }
  0x7b   :  { %282 = vsyncadd [#allocation4], 4294967280 }
  0x7c   :  { %173 = vsyncpa [#allocation3], 1 }
  0x7d   :  { %174 = vsyncpa [#allocation7], 1 }
  0x7e   :  { %175 = vsyncpa [#allocation4], 1 }
  0x7f   :  { %176 = vsyncpa [#allocation5], 1 }

</bundles_post_ra>
